<compile_context>
chip_gen: v6e
topology: v6e:2x2x1
jax: 0.10.0
libtpu: 0.0.40
codegen_flags: <defaults>
</compile_context>

<pallas_src>
import functools

import jax
import jax.numpy as jnp
from jax import lax
from jax.experimental import pallas as pl
from jax.experimental.pallas import tpu as pltpu


def _pick_tile(n, candidates):
    for t in candidates:
        if n % t == 0:
            return t
    return n


# ----------------------------------------------------------------------------
# Pallas kernels
# ----------------------------------------------------------------------------
def _mm_affine_kernel(*refs, relu, fuse_add):
    """(A @ B) * scale + bias [+ identity], optional ReLU.  K is the last grid axis."""
    if fuse_add:
        a_ref, b_ref, s_ref, c_ref, id_ref, o_ref, acc_ref = refs
    else:
        a_ref, b_ref, s_ref, c_ref, o_ref, acc_ref = refs
        id_ref = None

    @pl.when(pl.program_id(2) == 0)
    def _():
        acc_ref[...] = jnp.zeros_like(acc_ref)

    acc_ref[...] += jnp.dot(a_ref[...], b_ref[...],
                            preferred_element_type=jnp.float32)

    @pl.when(pl.program_id(2) == pl.num_programs(2) - 1)
    def _():
        y = acc_ref[...] * s_ref[...] + c_ref[...]
        if fuse_add:
            y = y + id_ref[...].astype(jnp.float32)
        if relu:
            y = jnp.maximum(y, 0.0)
        o_ref[...] = y.astype(o_ref.dtype)


def _conv3x3_s1_kernel(x_ref, w_ref, s_ref, c_ref, o_ref, *, relu):
    """Direct 3x3 / stride-1 / pad-1 conv + folded BN (+ReLU).

    x_ref: (1, H+2, W+2, Cin)   whole padded image (bf16)
    w_ref: (9, Cin, TCO)        weight taps (bf16)
    s_ref, c_ref: (1, TCO)      folded BN scale / bias (f32)
    o_ref: (1, 1, OW, TCO)      one output row (bf16)
    """
    ow = o_ref.shape[2]
    tco = o_ref.shape[3]
    r = pl.program_id(1)
    acc = jnp.zeros((ow, tco), jnp.float32)
    for t in range(9):
        di, dj = divmod(t, 3)
        xs = x_ref[0, r + di, pl.ds(dj, ow), :]          # (OW, Cin)
        acc = acc + jnp.dot(xs, w_ref[t], preferred_element_type=jnp.float32)
    y = acc * s_ref[...] + c_ref[...]
    if relu:
        y = jnp.maximum(y, 0.0)
    o_ref[0, 0] = y.astype(o_ref.dtype)


def _maxpool_kernel(p_ref, o_ref):
    """3x3 / stride-2 / pad-1 max pool over phase-decimated input.

    p_ref: (1, 4, OH+1, OW+1, C)  phases (even/even, even/odd, odd/even, odd/odd)
    o_ref: (1, OH, OW, C)
    """
    oh = o_ref.shape[1]
    ow = o_ref.shape[2]

    def tap(phase, a, b):
        return p_ref[0, phase, pl.ds(a, oh), pl.ds(b, ow), :]

    m = tap(0, 0, 0)
    for (phase, a, b) in ((0, 0, 1), (0, 1, 0), (0, 1, 1),
                          (1, 0, 0), (1, 1, 0),
                          (2, 0, 0), (2, 0, 1),
                          (3, 0, 0)):
        m = jnp.maximum(m, tap(phase, a, b))
    o_ref[0] = m


def _avgpool_kernel(x_ref, o_ref):
    # x: (1, H*W, C) -> mean over spatial axis
    o_ref[...] = jnp.mean(x_ref[...].astype(jnp.float32),
                          axis=1).astype(o_ref.dtype)


# ----------------------------------------------------------------------------
# Pallas wrappers
# ----------------------------------------------------------------------------
@functools.partial(jax.jit, static_argnames=("relu", "out_dtype"))
def matmul_affine(a, b, scale, bias, identity=None, *, relu,
                  out_dtype=jnp.bfloat16):
    """out[:M] = relu?((a @ b) * scale + bias [+ identity]) with f32 accumulation."""
    M, K = a.shape
    _, N = b.shape
    a = a.astype(jnp.bfloat16)
    b = b.astype(jnp.bfloat16)
    scale = scale.reshape(1, N).astype(jnp.float32)
    bias = bias.reshape(1, N).astype(jnp.float32)

    Mp = ((M + 7) // 8) * 8
    if Mp != M:
        a = jnp.pad(a, ((0, Mp - M), (0, 0)))
    if identity is not None:
        identity = identity.astype(jnp.bfloat16)
        if Mp != M:
            identity = jnp.pad(identity, ((0, Mp - M), (0, 0)))

    TM = _pick_tile(Mp, (256, 128, 64, 32, 16, 8))
    TN = _pick_tile(N, (256, 128))
    TK = _pick_tile(K, (512, 384, 256, 128))
    grid = (Mp // TM, N // TN, K // TK)

    fuse_add = identity is not None
    kernel = functools.partial(_mm_affine_kernel, relu=relu, fuse_add=fuse_add)

    in_specs = [
        pl.BlockSpec((TM, TK), lambda i, j, k: (i, k)),
        pl.BlockSpec((TK, TN), lambda i, j, k: (k, j)),
        pl.BlockSpec((1, TN), lambda i, j, k: (0, j)),
        pl.BlockSpec((1, TN), lambda i, j, k: (0, j)),
    ]
    args = [a, b, scale, bias]
    if fuse_add:
        in_specs.append(pl.BlockSpec((TM, TN), lambda i, j, k: (i, j)))
        args.append(identity)

    out = pl.pallas_call(
        kernel,
        out_shape=jax.ShapeDtypeStruct((Mp, N), out_dtype),
        grid_spec=pltpu.PrefetchScalarGridSpec(
            num_scalar_prefetch=0,
            grid=grid,
            in_specs=in_specs,
            out_specs=pl.BlockSpec((TM, TN), lambda i, j, k: (i, j)),
            scratch_shapes=[pltpu.VMEM((TM, TN), jnp.float32)],
        ),
        compiler_params=pltpu.CompilerParams(
            dimension_semantics=("parallel", "parallel", "arbitrary")),
    )(*args)
    if Mp != M:
        out = out[:M]
    return out


@functools.partial(jax.jit, static_argnames=("relu",))
def conv3x3_bn_direct(x, w_taps, scale, bias, *, relu):
    """3x3 stride-1 pad-1 conv + BN (+ReLU), reading the padded activation directly."""
    n, h, wd, cin = x.shape
    cout = w_taps.shape[2]
    oh, ow = h, wd
    xp = jnp.pad(x, ((0, 0), (1, 1), (1, 1), (0, 0)))
    scale = scale.reshape(1, cout).astype(jnp.float32)
    bias = bias.reshape(1, cout).astype(jnp.float32)
    tco = _pick_tile(cout, (256, 128))
    grid = (n, oh, cout // tco)
    kernel = functools.partial(_conv3x3_s1_kernel, relu=relu)
    return pl.pallas_call(
        kernel,
        out_shape=jax.ShapeDtypeStruct((n, oh, ow, cout), jnp.bfloat16),
        grid_spec=pltpu.PrefetchScalarGridSpec(
            num_scalar_prefetch=0,
            grid=grid,
            in_specs=[
                pl.BlockSpec((1, h + 2, wd + 2, cin), lambda b, r, j: (b, 0, 0, 0)),
                pl.BlockSpec((9, cin, tco), lambda b, r, j: (0, 0, j)),
                pl.BlockSpec((1, tco), lambda b, r, j: (0, j)),
                pl.BlockSpec((1, tco), lambda b, r, j: (0, j)),
            ],
            out_specs=pl.BlockSpec((1, 1, ow, tco), lambda b, r, j: (b, r, 0, j)),
        ),
        compiler_params=pltpu.CompilerParams(
            dimension_semantics=("parallel", "parallel", "parallel")),
    )(xp, w_taps, scale, bias)


@jax.jit
def maxpool3x3_s2(x):
    """MaxPool2d(kernel_size=3, stride=2, padding=1) — PyTorch semantics (-inf pad)."""
    n, h, w, c = x.shape
    oh = (h + 2 - 3) // 2 + 1
    ow = (w + 2 - 3) // 2 + 1
    xp = jnp.pad(x, ((0, 0), (1, 1), (1, 1), (0, 0)),
                 constant_values=-jnp.inf)
    # 4 phase decimations (same total bytes as xp -- no 9x window expansion).
    phases = jnp.stack(
        [xp[:, p::2, q::2, :][:, :oh + 1, :ow + 1, :]
         for p in (0, 1) for q in (0, 1)], axis=1)        # (N, 4, OH+1, OW+1, C)
    return pl.pallas_call(
        _maxpool_kernel,
        out_shape=jax.ShapeDtypeStruct((n, oh, ow, c), x.dtype),
        grid_spec=pltpu.PrefetchScalarGridSpec(
            num_scalar_prefetch=0,
            grid=(n,),
            in_specs=[pl.BlockSpec((1, 4, oh + 1, ow + 1, c),
                                   lambda b: (b, 0, 0, 0, 0))],
            out_specs=pl.BlockSpec((1, oh, ow, c), lambda b: (b, 0, 0, 0)),
        ),
        compiler_params=pltpu.CompilerParams(dimension_semantics=("parallel",)),
    )(phases)


@jax.jit
def global_avgpool(x):
    n, h, w, c = x.shape
    x2 = x.reshape(n, h * w, c)
    return pl.pallas_call(
        _avgpool_kernel,
        out_shape=jax.ShapeDtypeStruct((n, c), x.dtype),
        grid_spec=pltpu.PrefetchScalarGridSpec(
            num_scalar_prefetch=0,
            grid=(n,),
            in_specs=[pl.BlockSpec((1, h * w, c), lambda i: (i, 0, 0))],
            out_specs=pl.BlockSpec((1, c), lambda i: (i, 0)),
        ),
        compiler_params=pltpu.CompilerParams(dimension_semantics=("parallel",)),
    )(x2)


# ----------------------------------------------------------------------------
# Conv glue (1x1 matmul path, im2col fallback, 3x3 dispatch)
# ----------------------------------------------------------------------------
def _im2col(x, kh, kw, stride, pad):
    x = jnp.pad(x, ((0, 0), (pad, pad), (pad, pad), (0, 0)))
    N, H, W, C = x.shape
    OH = (H - kh) // stride + 1
    OW = (W - kw) // stride + 1
    cols = []
    for i in range(kh):
        for j in range(kw):
            patch = lax.slice(
                x, (0, i, j, 0),
                (N, i + (OH - 1) * stride + 1, j + (OW - 1) * stride + 1, C),
                (1, stride, stride, 1))
            cols.append(patch)
    patches = jnp.concatenate(cols, axis=-1)          # (N, OH, OW, kh*kw*C)
    return patches.reshape(N * OH * OW, kh * kw * C), (N, OH, OW)


@functools.partial(jax.jit, static_argnames=("relu", "stride"))
def conv1x1_bn(x, w, scale, bias, identity=None, *, relu, stride=1):
    """1x1 conv (optionally strided) + folded BN, optional fused residual add+ReLU."""
    if stride != 1:
        x = x[:, ::stride, ::stride, :]
    n, h, wd, cin = x.shape
    cout = w.shape[1]
    a = x.reshape(n * h * wd, cin)
    idm = identity.reshape(n * h * wd, cout) if identity is not None else None
    out = matmul_affine(a, w, scale, bias, idm, relu=relu)
    return out.reshape(n, h, wd, cout)


@functools.partial(jax.jit, static_argnames=("kh", "kw", "stride", "pad", "relu"))
def conv_im2col_bn(x, w_taps, scale, bias, *, kh, kw, stride, pad, relu):
    """im2col + matmul path (7x7 stem, strided and small-map 3x3 convs)."""
    cin = x.shape[3]
    cout = w_taps.shape[2]
    patches, (n, oh, ow) = _im2col(x, kh, kw, stride, pad)
    out = matmul_affine(patches, w_taps.reshape(kh * kw * cin, cout),
                        scale, bias, relu=relu)
    return out.reshape(n, oh, ow, cout)


def conv3x3_bn(x, w_taps, scale, bias, *, stride, relu):
    wd = x.shape[2]
    ow = (wd + 2 - 3) // stride + 1
    if stride == 1 and ow % 8 == 0:
        # Direct kernel: no im2col materialization in HBM.
        return conv3x3_bn_direct(x, w_taps, scale, bias, relu=relu)
    # TODO(synk): strided / tiny-map 3x3 convs still use im2col + matmul.
    return conv_im2col_bn(x, w_taps, scale, bias, kh=3, kw=3,
                          stride=stride, pad=1, relu=relu)


# ----------------------------------------------------------------------------
# Deterministic parameter construction (synthetic weights, no checkpoint)
# ----------------------------------------------------------------------------
def _conv_weight(key, kh, kw, cin, cout):
    std = (2.0 / (cout * kh * kw)) ** 0.5   # kaiming normal, fan_out, relu
    return std * jax.random.normal(key, (kh, kw, cin, cout), jnp.float32)


def _bn_params(key, c, eps=1e-5):
    k1, k2 = jax.random.split(key)
    gamma = 1.0 + 0.1 * jax.random.normal(k1, (c,), jnp.float32)
    beta = 0.1 * jax.random.normal(k2, (c,), jnp.float32)
    running_mean = jnp.zeros((c,), jnp.float32)
    running_var = jnp.ones((c,), jnp.float32)
    scale = gamma / jnp.sqrt(running_var + eps)
    bias = beta - running_mean * scale
    return scale.reshape(1, c), bias.reshape(1, c)


def _make_bottleneck(key, inplanes, planes, stride):
    keys = jax.random.split(key, 8)
    p = {
        "conv1": _conv_weight(keys[0], 1, 1, inplanes, planes)
                 .reshape(inplanes, planes).astype(jnp.bfloat16),
        "bn1": _bn_params(keys[1], planes),
        "conv2": _conv_weight(keys[2], 3, 3, planes, planes)
                 .reshape(9, planes, planes).astype(jnp.bfloat16),
        "bn2": _bn_params(keys[3], planes),
        "conv3": _conv_weight(keys[4], 1, 1, planes, planes * 4)
                 .reshape(planes, planes * 4).astype(jnp.bfloat16),
        "bn3": _bn_params(keys[5], planes * 4),
        "stride": stride,
    }
    if stride != 1 or inplanes != planes * 4:
        p["down_conv"] = _conv_weight(keys[6], 1, 1, inplanes, planes * 4) \
                         .reshape(inplanes, planes * 4).astype(jnp.bfloat16)
        p["down_bn"] = _bn_params(keys[7], planes * 4)
    return p


def _make_layer(key, inplanes, planes, blocks, stride):
    keys = jax.random.split(key, blocks)
    params = [_make_bottleneck(keys[0], inplanes, planes, stride)]
    inplanes = planes * 4
    for i in range(1, blocks):
        params.append(_make_bottleneck(keys[i], inplanes, planes, 1))
    return params, inplanes


def make_model_params(key, num_classes):
    keys = jax.random.split(key, 8)
    params = {
        "conv1": _conv_weight(keys[0], 7, 7, 1, 64)
                 .reshape(49, 1, 64).astype(jnp.bfloat16),   # 1-channel stem
        "bn1": _bn_params(keys[1], 64),
    }
    inplanes = 64
    params["layer1"], inplanes = _make_layer(keys[2], inplanes, 64, 3, 1)
    params["layer2"], inplanes = _make_layer(keys[3], inplanes, 128, 4, 2)
    params["layer3"], inplanes = _make_layer(keys[4], inplanes, 256, 6, 2)
    params["layer4"], inplanes = _make_layer(keys[5], inplanes, 512, 3, 2)
    kw_, kb_ = jax.random.split(keys[6])
    std = 1.0 / (inplanes ** 0.5)
    params["fc_w"] = (std * jax.random.normal(
        kw_, (inplanes, num_classes), jnp.float32)).astype(jnp.bfloat16)
    params["fc_b"] = std * jax.random.normal(kb_, (1, num_classes), jnp.float32)
    params["fc_scale"] = jnp.ones((1, num_classes), jnp.float32)
    return params


# ----------------------------------------------------------------------------
# Forward pass (mirrors LargeResNet.forward)
# ----------------------------------------------------------------------------
def _bottleneck_forward(x, p):
    s1, b1 = p["bn1"]
    s2, b2 = p["bn2"]
    s3, b3 = p["bn3"]
    out = conv1x1_bn(x, p["conv1"], s1, b1, relu=True)
    out = conv3x3_bn(out, p["conv2"], s2, b2, stride=p["stride"], relu=True)
    if "down_conv" in p:
        ds, db = p["down_bn"]
        identity = conv1x1_bn(x, p["down_conv"], ds, db, relu=False,
                              stride=p["stride"])
    else:
        identity = x
    # conv3 + bn3 with the residual add and final ReLU fused into the matmul epilogue.
    return conv1x1_bn(out, p["conv3"], s3, b3, identity, relu=True)


def large_resnet_forward(x_nchw, params):
    x = jnp.transpose(x_nchw, (0, 2, 3, 1)).astype(jnp.bfloat16)  # NCHW -> NHWC
    s, b = params["bn1"]
    x = conv_im2col_bn(x, params["conv1"], s, b,
                       kh=7, kw=7, stride=2, pad=3, relu=True)    # conv1+bn1+relu
    x = maxpool3x3_s2(x)                                          # maxpool
    for p in params["layer1"]:
        x = _bottleneck_forward(x, p)
    x = maxpool3x3_s2(x)                                          # maxpool2
    for p in params["layer2"]:
        x = _bottleneck_forward(x, p)
    for p in params["layer3"]:
        x = _bottleneck_forward(x, p)
    for p in params["layer4"]:
        x = _bottleneck_forward(x, p)
    feats = global_avgpool(x)                                     # avgpool + flatten
    logits = matmul_affine(feats, params["fc_w"], params["fc_scale"],
                           params["fc_b"], relu=False,
                           out_dtype=jnp.float32)                 # fc
    return logits


# ----------------------------------------------------------------------------
if __name__ == "__main__":
    key = jax.random.PRNGKey(0)
    k_param, k_input = jax.random.split(key)

    num_classes = 10
    params = make_model_params(k_param, num_classes)

    # Input matches the module: 1-channel images, NCHW. 64x64 keeps every
    # intermediate spatial size valid through the 6 stride-2 stages.
    x = jax.random.normal(k_input, (2, 1, 64, 64), jnp.float32)

    logits = large_resnet_forward(x, params)
    logits = jax.block_until_ready(logits)

    assert logits.shape == (2, num_classes), logits.shape
    assert jnp.all(jnp.isfinite(logits))
    print("KERNEL_OK")
</pallas_src>

<mosaic_0001>
module attributes {stable_mosaic.version = 11 : i64} {
  func.func @_mm_affine_kernel(%arg0: i32, %arg1: i32, %arg2: i32, %arg3: memref<256x49xbf16, #tpu.memory_space<vmem>>, %arg4: memref<49x64xbf16, #tpu.memory_space<vmem>>, %arg5: memref<1x64xf32, #tpu.memory_space<vmem>>, %arg6: memref<1x64xf32, #tpu.memory_space<vmem>>, %arg7: memref<256x64xbf16, #tpu.memory_space<vmem>>, %arg8: memref<256x64xf32, #tpu.memory_space<vmem>>) attributes {dimension_semantics = [#tpu.dimension_semantics<parallel>, #tpu.dimension_semantics<parallel>, #tpu.dimension_semantics<arbitrary>], iteration_bounds = array<i64: 8, 1, 1>, scalar_prefetch = 0 : i64, scratch_operands = 1 : i64, tpu.core_type = #tpu.core_type<tc>, window_params = [{transform_indices = @transform_0, window_bounds = array<i64: 256, 49>}, {transform_indices = @transform_1, window_bounds = array<i64: 49, 64>}, {transform_indices = @transform_2, window_bounds = array<i64: 1, 64>}, {transform_indices = @transform_3, window_bounds = array<i64: 1, 64>}, {transform_indices = @transform_4, window_bounds = array<i64: 256, 64>}]} {
    %c0_i32 = arith.constant 0 : i32
    %0 = arith.cmpi eq, %arg2, %c0_i32 : i32
    %1 = arith.extui %0 : i1 to i32
    %c0_i32_0 = arith.constant 0 : i32
    %2 = arith.cmpi ne, %1, %c0_i32_0 : i32
    scf.if %2 {
      %cst_10 = arith.constant 0.000000e+00 : f32
      %12 = vector.broadcast %cst_10 : f32 to vector<256x64xf32>
      %c0_11 = arith.constant 0 : index
      %c0_12 = arith.constant 0 : index
      %13 = vector.load %arg8[%c0_11, %c0_12] : memref<256x64xf32, #tpu.memory_space<vmem>>, vector<256x64xf32>
      tpu.vector_store %arg8[%c0_11, %c0_12], %12 {strides = array<i32>} : memref<256x64xf32, #tpu.memory_space<vmem>>, vector<256x64xf32>,
    } else {
    }
    %c0 = arith.constant 0 : index
    %c0_1 = arith.constant 0 : index
    %3 = vector.load %arg8[%c0, %c0_1] : memref<256x64xf32, #tpu.memory_space<vmem>>, vector<256x64xf32>
    %c0_2 = arith.constant 0 : index
    %c0_3 = arith.constant 0 : index
    %4 = vector.load %arg3[%c0_2, %c0_3] : memref<256x49xbf16, #tpu.memory_space<vmem>>, vector<256x49xbf16>
    %c0_4 = arith.constant 0 : index
    %c0_5 = arith.constant 0 : index
    %5 = vector.load %arg4[%c0_4, %c0_5] : memref<49x64xbf16, #tpu.memory_space<vmem>>, vector<49x64xbf16>
    %cst = arith.constant dense<0.000000e+00> : vector<256x64xf32>
    %6 = tpu.matmul %4, %5, %cst {dimension_numbers = #tpu.dot_dimension_numbers<[1], [0], [0], [1], [0, 0, 1, 1], [], []>} : vector<256x49xbf16>, vector<49x64xbf16>, vector<256x64xf32> -> vector<256x64xf32>
    %7 = arith.addf %3, %6 : vector<256x64xf32>
    %c0_6 = arith.constant 0 : index
    %c0_7 = arith.constant 0 : index
    %8 = vector.load %arg8[%c0_6, %c0_7] : memref<256x64xf32, #tpu.memory_space<vmem>>, vector<256x64xf32>
    tpu.vector_store %arg8[%c0_6, %c0_7], %7 {strides = array<i32>} : memref<256x64xf32, #tpu.memory_space<vmem>>, vector<256x64xf32>,
    %c0_i32_8 = arith.constant 0 : i32
    %9 = arith.cmpi eq, %arg2, %c0_i32_8 : i32
    %10 = arith.extui %9 : i1 to i32
    %c0_i32_9 = arith.constant 0 : i32
    %11 = arith.cmpi ne, %10, %c0_i32_9 : i32
    scf.if %11 {
      %c0_10 = arith.constant 0 : index
      %c0_11 = arith.constant 0 : index
      %12 = vector.load %arg8[%c0_10, %c0_11] : memref<256x64xf32, #tpu.memory_space<vmem>>, vector<256x64xf32>
      %c0_12 = arith.constant 0 : index
      %c0_13 = arith.constant 0 : index
      %13 = vector.load %arg5[%c0_12, %c0_13] : memref<1x64xf32, #tpu.memory_space<vmem>>, vector<1x64xf32>
      %14 = vector.broadcast %13 : vector<1x64xf32> to vector<256x64xf32>
      %15 = arith.mulf %12, %14 : vector<256x64xf32>
      %c0_14 = arith.constant 0 : index
      %c0_15 = arith.constant 0 : index
      %16 = vector.load %arg6[%c0_14, %c0_15] : memref<1x64xf32, #tpu.memory_space<vmem>>, vector<1x64xf32>
      %17 = vector.broadcast %16 : vector<1x64xf32> to vector<256x64xf32>
      %18 = arith.addf %15, %17 : vector<256x64xf32>
      %cst_16 = arith.constant 0.000000e+00 : f32
      %19 = vector.broadcast %cst_16 : f32 to vector<256x64xf32>
      %20 = arith.maximumf %18, %19 : vector<256x64xf32>
      %21 = arith.truncf %20 : vector<256x64xf32> to vector<256x64xbf16>
      %c0_17 = arith.constant 0 : index
      %c0_18 = arith.constant 0 : index
      %22 = vector.load %arg7[%c0_17, %c0_18] : memref<256x64xbf16, #tpu.memory_space<vmem>>, vector<256x64xbf16>
      tpu.vector_store %arg7[%c0_17, %c0_18], %21 {strides = array<i32>} : memref<256x64xbf16, #tpu.memory_space<vmem>>, vector<256x64xbf16>,
    } else {
    }
    return
  }
  func.func @transform_0(%arg0: i32, %arg1: i32, %arg2: i32) -> (i32, i32) {
    %c0_i32 = arith.constant 0 : i32
    return %arg0, %arg2 : i32, i32
  }
  func.func @transform_1(%arg0: i32, %arg1: i32, %arg2: i32) -> (i32, i32) {
    %c0_i32 = arith.constant 0 : i32
    return %arg2, %arg1 : i32, i32
  }
  func.func @transform_2(%arg0: i32, %arg1: i32, %arg2: i32) -> (i32, i32) {
    %c0_i32 = arith.constant 0 : i32
    %c0_i32_0 = arith.constant 0 : i32
    return %c0_i32, %arg1 : i32, i32
  }
  func.func @transform_3(%arg0: i32, %arg1: i32, %arg2: i32) -> (i32, i32) {
    %c0_i32 = arith.constant 0 : i32
    %c0_i32_0 = arith.constant 0 : i32
    return %c0_i32, %arg1 : i32, i32
  }
  func.func @transform_4(%arg0: i32, %arg1: i32, %arg2: i32) -> (i32, i32) {
    %c0_i32 = arith.constant 0 : i32
    return %arg0, %arg1 : i32, i32
  }
}

</mosaic_0001>

<bundles_post_ra>
// kernel: matmul_affine.1
= control target key start
LH: loop header
LB: loop body
LE: loop exit
PB: predicated region body
PF: predicated region fallthrough
CT: control target
= control target key end

     0   :  { %s1501_s15 = smov 0   ;;  %s1503_s16 = smov 0   ;;  %s1828_s0 = inlined_call_operand.vmem [shape: bf16[2048,49], index: 0, kind: input, shape index: {}]   ;;  %s1829_s1 = inlined_call_operand.vmem [shape: bf16[49,64], index: 1, kind: input, shape index: {}]   ;;  %s1830_s2 = inlined_call_operand.vmem [shape: f32[1,64], index: 2, kind: input, shape index: {}]   ;;  %s1831_s3 = inlined_call_operand.vmem [shape: f32[1,64], index: 3, kind: input, shape index: {}]   ;;  %s1832_s4 = inlined_call_operand.vmem [shape: bf16[2048,64], index: 4, kind: output, shape index: {}]  }
   0x1   :  { %s1505_s17 = smov 0  }
   0x2 LB: > { %s33_s18 = sadd.s32 1, %s1468_s16  ;;  %p1227_p0 = scmp.ge.s32.totalorder %s1472_s17, 1  ;;  %s1472_s17 = sphi %s1505_s17, %s14_s17   ;;  %s1468_s16 = sphi %s1503_s16, %s1835_s16   ;;  %s1464_s15 = sphi %s1501_s15, %s1834_s15  }
   0x3   : > { %p35_p1 = scmp.ge.s32.totalorder %s33_s18, 8  ;;  %p221_p2 = scmp.lt.s32.totalorder %s1472_s17, 9 }
   0x5   : > { %s1837_s18 = smov (%p35_p1, %s33_s18), 0  ;;  %p222_p3 = pnand %p1227_p0, %p221_p2 }
   0x6   : > { %s1228_s23 = sshll.u32 (!%p222_p3), %s1464_s15, 5 }
   0x7   : > { %225 = sbr.rel (%p222_p3) target bundleno = 286 (0x11e), region = 36  ;;  %p1530_p4 = scmp.lt.s32.totalorder (!%p222_p3), %s1228_s23, 255 }
   0xc   : > { %v1430_v0 = vld [vmem:[%s1829_s1 + $0x18] ss:$0 sps:$4 sm:$0x11]   ;;  %vm559_vm0 = vcmask 1040384   ;;  %v1474_v1 = vmov 0   ;;  %v1431_v4 = vld [vmem:[%s1829_s1 + $0x10] sm:$0xff]  }
   0xd   : > { %v561_v2 = vsel %vm559_vm0, 65535, %v1474_v1  ;;  %vm305_vm1 = vcmask 523264   ;;  %v1475_v5 = vmov 0.0   ;;  %s1839_s23 = smov (!%p1530_p4, %s1228_s23), 255  ;;  %v1432_v6 = vld [vmem:[%s1829_s1 + $0x8] sm:$0xff]   ;;  %v1433_v7 = vld [vmem:[%s1829_s1] sm:$0xff]  }
   0xe   : > { %v563_v3 = vand.u32 %v1430_v0, %v561_v2  ;;  %308 = vst.msk [vmem:[#allocation2 + $0x10] sm:$0xff] %vm305_vm1, %v1475_v5  ;;  %306 = vst.msk [vmem:[#allocation2] sm:$0xff] %vm305_vm1, %v1475_v5  ;;  %s1229_s27 = sshll.u32 %s1839_s23, 2  ;;  %vm510_vm2 = vcmask 400384   ;;  %v1627_v50 = vld [vmem:[%s1830_s2] ss:$0 sm:$0xff] }
   0xf   : > { %307 = vst.msk [vmem:[#allocation2 + $0x8] sm:$0xff] %vm305_vm1, %v1475_v5  ;;  %309 = vst.msk [vmem:[#allocation2 + $0x18] sm:$0xff] %vm305_vm1, %v1475_v5  ;;  %s1584_s6 = scalar_lea.vmem %s1828_s0, %s1229_s27  ;;  %v1634_v58 = vld [vmem:[%s1831_s3] ss:$0 sm:$0xff]  ;;  %vm1064_vm3 = vcmask 519168   ;;  %s1653_s13 = scalar_lea.vmem %s1832_s4, %s1229_s27 }
  0x10   : > { %1356 = vmatprep.subr.bf16.mxu0 %v563_v3  ;;  %1396 = vmatprep.subr.bf16.mxu1 %v563_v3  ;;  %310 = vst.msk [vmem:[#allocation2 + $0x20] sm:$0xff] %vm305_vm1, %v1475_v5  ;;  %311 = vst.msk [vmem:[#allocation2 + $0x28] sm:$0xff] %vm305_vm1, %v1475_v5  ;;  %v1434_v8 = vld [vmem:[%s1584_s6] sm:$0xff]   ;;  %v1436_v10 = vld [vmem:[%s1584_s6 + $0x8] sm:$0xff]  }
  0x11   : > { %312 = vst.msk [vmem:[#allocation2 + $0x30] sm:$0xff] %vm305_vm1, %v1475_v5  ;;  %313 = vst.msk [vmem:[#allocation2 + $0x38] sm:$0xff] %vm305_vm1, %v1475_v5  ;;  %1357 = vmatpush3.bf16.msra.mxu0 %v563_v3  ;;  %1400 = vmatpush3.bf16.msra.mxu1 %v563_v3  ;;  %v1435_v9 = vld [vmem:[%s1584_s6 + $0x40] sm:$0xff]   ;;  %v1437_v11 = vld [vmem:[%s1584_s6 + $0x48] sm:$0xff]  }
  0x12   : > { %314 = vst.msk [vmem:[#allocation2 + $0x40] sm:$0xff] %vm305_vm1, %v1475_v5  ;;  %315 = vst.msk [vmem:[#allocation2 + $0x48] sm:$0xff] %vm305_vm1, %v1475_v5  ;;  %1358 = vmatprep.subr.bf16.mxu0 %v1431_v4  ;;  %1397 = vmatprep.subr.bf16.mxu1 %v1431_v4  ;;  %v1438_v12 = vld [vmem:[%s1584_s6 + $0x10] sm:$0xff]   ;;  %v1440_v14 = vld [vmem:[%s1584_s6 + $0x18] sm:$0xff]  }
  0x13   : > { %316 = vst.msk [vmem:[#allocation2 + $0x50] sm:$0xff] %vm305_vm1, %v1475_v5  ;;  %317 = vst.msk [vmem:[#allocation2 + $0x58] sm:$0xff] %vm305_vm1, %v1475_v5  ;;  %1364 = vmatprep.mubr.msk.bf16.mxu0 %vm510_vm2, %v1434_v8  ;;  %1380 = vmatprep.mubr.msk.bf16.mxu1 %vm510_vm2, %v1435_v9  ;;  %v1439_v13 = vld [vmem:[%s1584_s6 + $0x50] sm:$0xff]   ;;  %v1441_v15 = vld [vmem:[%s1584_s6 + $0x58] sm:$0xff]  }
  0x14   : > { %318 = vst.msk [vmem:[#allocation2 + $0x60] sm:$0xff] %vm305_vm1, %v1475_v5  ;;  %319 = vst.msk [vmem:[#allocation2 + $0x68] sm:$0xff] %vm305_vm1, %v1475_v5  ;;  %v1442_v16 = vld [vmem:[%s1584_s6 + $0x20] sm:$0xff]   ;;  %v1444_v18 = vld [vmem:[%s1584_s6 + $0x28] sm:$0xff]  }
  0x15   : > { %320 = vst.msk [vmem:[#allocation2 + $0x70] sm:$0xff] %vm305_vm1, %v1475_v5  ;;  %321 = vst.msk [vmem:[#allocation2 + $0x78] sm:$0xff] %vm305_vm1, %v1475_v5  ;;  %1359 = vmatpush3.bf16.msra.mxu0 %v1431_v4  ;;  %1401 = vmatpush3.bf16.msra.mxu1 %v1431_v4  ;;  %v1443_v17 = vld [vmem:[%s1584_s6 + $0x60] sm:$0xff]   ;;  %v1445_v19 = vld [vmem:[%s1584_s6 + $0x68] sm:$0xff]  }
  0x16   : > { %322 = vst.msk [vmem:[#allocation2 + $0x80] sm:$0xff] %vm305_vm1, %v1475_v5  ;;  %323 = vst.msk [vmem:[#allocation2 + $0x88] sm:$0xff] %vm305_vm1, %v1475_v5  ;;  %1360 = vmatprep.subr.bf16.mxu0 %v1432_v6  ;;  %1398 = vmatprep.subr.bf16.mxu1 %v1432_v6  ;;  %v1446_v20 = vld [vmem:[%s1584_s6 + $0x30] sm:$0xff]   ;;  %v1448_v22 = vld [vmem:[%s1584_s6 + $0x38] sm:$0xff]  }
  0x17   : > { %324 = vst.msk [vmem:[#allocation2 + $0x90] sm:$0xff] %vm305_vm1, %v1475_v5  ;;  %325 = vst.msk [vmem:[#allocation2 + $0x98] sm:$0xff] %vm305_vm1, %v1475_v5  ;;  %v1447_v21 = vld [vmem:[%s1584_s6 + $0x70] sm:$0xff]   ;;  %v1449_v23 = vld [vmem:[%s1584_s6 + $0x78] sm:$0xff]  }
  0x18   : > { %326 = vst.msk [vmem:[#allocation2 + $0xa0] sm:$0xff] %vm305_vm1, %v1475_v5  ;;  %327 = vst.msk [vmem:[#allocation2 + $0xa8] sm:$0xff] %vm305_vm1, %v1475_v5  ;;  %v340_v24 = vld [vmem:[#allocation2 + $0x10] sm:$0xff]  ;;  %v338_v28 = vld [vmem:[#allocation2] sm:$0xff] }
  0x19   : > { %328 = vst.msk [vmem:[#allocation2 + $0xb0] sm:$0xff] %vm305_vm1, %v1475_v5  ;;  %329 = vst.msk [vmem:[#allocation2 + $0xb8] sm:$0xff] %vm305_vm1, %v1475_v5  ;;  %1361 = vmatpush3.bf16.msra.mxu0 %v1432_v6  ;;  %1402 = vmatpush3.bf16.msra.mxu1 %v1432_v6  ;;  %v341_v34 = vld [vmem:[#allocation2 + $0x18] sm:$0xff]  ;;  %v339_v40 = vld [vmem:[#allocation2 + $0x8] sm:$0xff] }
  0x1a   : > { %330 = vst.msk [vmem:[#allocation2 + $0xc0] sm:$0xff] %vm305_vm1, %v1475_v5  ;;  %331 = vst.msk [vmem:[#allocation2 + $0xc8] sm:$0xff] %vm305_vm1, %v1475_v5  ;;  %1362 = vmatprep.subr.bf16.mxu0 %v1433_v7  ;;  %1399 = vmatprep.subr.bf16.mxu1 %v1433_v7  ;;  %v344_v46 = vld [vmem:[#allocation2 + $0x30] sm:$0xff]  ;;  %v342_v53 = vld [vmem:[#allocation2 + $0x20] sm:$0xff] }
  0x1b   : > { %332 = vst.msk [vmem:[#allocation2 + $0xd0] sm:$0xff] %vm305_vm1, %v1475_v5  ;;  %333 = vst.msk [vmem:[#allocation2 + $0xd8] sm:$0xff] %vm305_vm1, %v1475_v5  ;;  %v345_v2 = vld [vmem:[#allocation2 + $0x38] sm:$0xff] }
  0x1c   : > { %334 = vst.msk [vmem:[#allocation2 + $0xe0] sm:$0xff] %vm305_vm1, %v1475_v5  ;;  %335 = vst.msk [vmem:[#allocation2 + $0xe8] sm:$0xff] %vm305_vm1, %v1475_v5 }
  0x1d   : > { %336 = vst.msk [vmem:[#allocation2 + $0xf0] sm:$0xff] %vm305_vm1, %v1475_v5  ;;  %337 = vst.msk [vmem:[#allocation2 + $0xf8] sm:$0xff] %vm305_vm1, %v1475_v5  ;;  %1363 = vmatpush3.bf16.msra.mxu0 %v1433_v7  ;;  %1403 = vmatpush3.bf16.msra.mxu1 %v1433_v7  ;;  %v354_v29 = vld [vmem:[#allocation2 + $0x80] sm:$0xff]  ;;  %v355_v41 = vld [vmem:[#allocation2 + $0x88] sm:$0xff] }
  0x1e   : > { %v356_v25 = vld [vmem:[#allocation2 + $0x90] sm:$0xff]  ;;  %v357_v35 = vld [vmem:[#allocation2 + $0x98] sm:$0xff] }
  0x1f   : > { %v358_v54 = vld [vmem:[#allocation2 + $0xa0] sm:$0xff] }
  0x20   : > { %1365 = vmatmul.mubr.msk.bf16.vlgmr.msra.gmra.mxu0 %vm510_vm2, %v1436_v10  ;;  %1381 = vmatmul.mubr.msk.bf16.vlgmr.msra.gmra.mxu1 %vm510_vm2, %v1437_v11  ;;  %v360_v47 = vld [vmem:[#allocation2 + $0xb0] sm:$0xff]  ;;  %v361_v3 = vld [vmem:[#allocation2 + $0xb8] sm:$0xff] }
  0x21   : > { %1368 = vmatprep.mubr.msk.bf16.mxu0 %vm510_vm2, %v1438_v12  ;;  %1384 = vmatprep.mubr.msk.bf16.mxu1 %vm510_vm2, %v1439_v13  ;;  %v343_v12 = vld [vmem:[#allocation2 + $0x28] sm:$0xff] }
  0x22   : > { %v359_v13 = vld [vmem:[#allocation2 + $0xa8] sm:$0xff] }
  0x28   : > { %1369 = vmatmul.mubr.msk.bf16.gmra.mxu0 %vm510_vm2, %v1440_v14  ;;  %1385 = vmatmul.mubr.msk.bf16.gmra.mxu1 %vm510_vm2, %v1441_v15 }
  0x29   : > { %1372 = vmatprep.mubr.msk.bf16.mxu0 %vm510_vm2, %v1442_v16  ;;  %1388 = vmatprep.mubr.msk.bf16.mxu1 %vm510_vm2, %v1443_v17 }
  0x30   : > { %1373 = vmatmul.mubr.msk.bf16.gmra.mxu0 %vm510_vm2, %v1444_v18  ;;  %1389 = vmatmul.mubr.msk.bf16.gmra.mxu1 %vm510_vm2, %v1445_v19 }
  0x31   : > { %1376 = vmatprep.mubr.msk.bf16.mxu0 %vm510_vm2, %v1446_v20  ;;  %1392 = vmatprep.mubr.msk.bf16.mxu1 %vm510_vm2, %v1447_v21 }
  0x38   : > { %1377 = vmatmul.mubr.msk.bf16.gmra.mxu0 %vm510_vm2, %v1448_v22  ;;  %1393 = vmatmul.mubr.msk.bf16.gmra.mxu1 %vm510_vm2, %v1449_v23 }
  0xe0   : > { %v1366_v26 = vpop.f32.mrf.mxu0  ;;  %v1382_v27 = vpop.f32.mrf.mxu1 }
  0xe1   : > { %v728_v30 = vadd.f32 %v1366_v26, %v340_v24  ;;  %v744_v31 = vadd.f32 %v1382_v27, %v356_v25 }
  0xe2   : > { %v599_v32 = vpop.f32.mrf.mxu0  ;;  %v663_v33 = vpop.f32.mrf.mxu1 }
  0xe3   : > { %761 = vst.msk [vmem:[#allocation2 + $0x10] sm:$0xff] %vm305_vm1, %v728_v30  ;;  %777 = vst.msk [vmem:[#allocation2 + $0x90] sm:$0xff] %vm305_vm1, %v744_v31  ;;  %v726_v36 = vadd.f32 %v599_v32, %v338_v28  ;;  %v742_v37 = vadd.f32 %v663_v33, %v354_v29 }
  0xe4   : > { %v1367_v38 = vpop.f32.mrf.mxu0  ;;  %v1383_v39 = vpop.f32.mrf.mxu1 }
  0xe5   : > { %759 = vst.msk [vmem:[#allocation2] sm:$0xff] %vm305_vm1, %v726_v36  ;;  %775 = vst.msk [vmem:[#allocation2 + $0x80] sm:$0xff] %vm305_vm1, %v742_v37  ;;  %v729_v42 = vadd.f32 %v1367_v38, %v341_v34  ;;  %v745_v43 = vadd.f32 %v1383_v39, %v357_v35 }
  0xe6   : > { %v602_v44 = vpop.f32.mrf.mxu0  ;;  %v666_v45 = vpop.f32.mrf.mxu1 }
  0xe7   : > { %762 = vst.msk [vmem:[#allocation2 + $0x18] sm:$0xff] %vm305_vm1, %v729_v42  ;;  %778 = vst.msk [vmem:[#allocation2 + $0x98] sm:$0xff] %vm305_vm1, %v745_v43  ;;  %v727_v48 = vadd.f32 %v602_v44, %v339_v40  ;;  %v743_v49 = vadd.f32 %v666_v45, %v355_v41 }
  0xe8   : > { %v1370_v51 = vpop.f32.mrf.mxu0  ;;  %v1386_v52 = vpop.f32.mrf.mxu1 }
  0xe9   : > { %760 = vst.msk [vmem:[#allocation2 + $0x8] sm:$0xff] %vm305_vm1, %v727_v48  ;;  %776 = vst.msk [vmem:[#allocation2 + $0x88] sm:$0xff] %vm305_vm1, %v743_v49  ;;  %v732_v55 = vadd.f32 %v1370_v51, %v344_v46  ;;  %v748_v56 = vadd.f32 %v1386_v52, %v360_v47 }
  0xea   : > { %v796_v57 = vld [vmem:[#allocation2 + $0x10] sm:$0xff]  ;;  %v615_v60 = vpop.f32.mrf.mxu0  ;;  %v679_v61 = vpop.f32.mrf.mxu1 }
  0xeb   : > { %v812_v59 = vld [vmem:[#allocation2 + $0x90] sm:$0xff]  ;;  %v835_v62 = vmul.f32 %v1627_v50, %v796_v57  ;;  %765 = vst.msk [vmem:[#allocation2 + $0x30] sm:$0xff] %vm305_vm1, %v732_v55  ;;  %781 = vst.msk [vmem:[#allocation2 + $0xb0] sm:$0xff] %vm305_vm1, %v748_v56  ;;  %v730_v0 = vadd.f32 %v615_v60, %v342_v53  ;;  %v746_v1 = vadd.f32 %v679_v61, %v358_v54 }
  0xec   : > { %v851_v63 = vmul.f32 %v1627_v50, %v812_v59  ;;  %v794_v4 = vld [vmem:[#allocation2] sm:$0xff]  ;;  %v1371_v6 = vpop.f32.mrf.mxu0  ;;  %v1387_v7 = vpop.f32.mrf.mxu1 }
  0xed   : > { %v810_v5 = vld [vmem:[#allocation2 + $0x80] sm:$0xff]  ;;  %v874_v8 = vadd.f32 %v1634_v58, %v835_v62  ;;  %v833_v10 = vmul.f32 %v1627_v50, %v794_v4  ;;  %763 = vst.msk [vmem:[#allocation2 + $0x20] sm:$0xff] %vm305_vm1, %v730_v0  ;;  %779 = vst.msk [vmem:[#allocation2 + $0xa0] sm:$0xff] %vm305_vm1, %v746_v1  ;;  %v733_v16 = vadd.f32 %v1371_v6, %v345_v2 }
  0xee   : > { %v890_v9 = vadd.f32 %v1634_v58, %v851_v63  ;;  %v849_v11 = vmul.f32 %v1627_v50, %v810_v5  ;;  %v797_v14 = vld [vmem:[#allocation2 + $0x18] sm:$0xff]  ;;  %v749_v17 = vadd.f32 %v1387_v7, %v361_v3  ;;  %v618_v18 = vpop.f32.mrf.mxu0  ;;  %v682_v19 = vpop.f32.mrf.mxu1 }
  0xef   : > { %v813_v15 = vld [vmem:[#allocation2 + $0x98] sm:$0xff]  ;;  %v906_v20 = vmax.f32 %v874_v8, 0.0  ;;  %v872_v22 = vadd.f32 %v1634_v58, %v833_v10  ;;  %v836_v24 = vmul.f32 %v1627_v50, %v797_v14  ;;  %766 = vst.msk [vmem:[#allocation2 + $0x38] sm:$0xff] %vm305_vm1, %v733_v16  ;;  %v731_v28 = vadd.f32 %v618_v18, %v343_v12  ;;  %v348_v14 = vld [vmem:[#allocation2 + $0x50] sm:$0xff] }
  0xf0   : > { %v922_v21 = vmax.f32 %v890_v9, 0.0  ;;  %v888_v23 = vadd.f32 %v1634_v58, %v849_v11  ;;  %v852_v25 = vmul.f32 %v1627_v50, %v813_v15  ;;  %v795_v26 = vld [vmem:[#allocation2 + $0x8] sm:$0xff]  ;;  %782 = vst.msk [vmem:[#allocation2 + $0xb8] sm:$0xff] %vm305_vm1, %v749_v17  ;;  %v747_v29 = vadd.f32 %v682_v19, %v359_v13  ;;  %v1659_v30 = vpop.f32.mrf.mxu0  ;;  %v1661_v31 = vpop.f32.mrf.mxu1  ;;  %v364_v15 = vld [vmem:[#allocation2 + $0xd0] sm:$0xff] }
  0xf1   : > { %v811_v27 = vld [vmem:[#allocation2 + $0x88] sm:$0xff]  ;;  %v1306_v32 = vpack.c.bf16 %v906_v20, %v906_v20  ;;  %v904_v34 = vmax.f32 %v872_v22, 0.0  ;;  %v875_v36 = vadd.f32 %v1634_v58, %v836_v24  ;;  %v834_v38 = vmul.f32 %v1627_v50, %v795_v26  ;;  %764 = vst.msk [vmem:[#allocation2 + $0x28] sm:$0xff] %vm305_vm1, %v731_v28  ;;  %v346_v24 = vld [vmem:[#allocation2 + $0x40] sm:$0xff] }
  0xf2   : > { %v1322_v33 = vpack.c.bf16 %v922_v21, %v922_v21  ;;  %v920_v35 = vmax.f32 %v888_v23, 0.0  ;;  %v891_v37 = vadd.f32 %v1634_v58, %v852_v25  ;;  %v850_v39 = vmul.f32 %v1627_v50, %v811_v27  ;;  %v800_v40 = vld [vmem:[#allocation2 + $0x30] sm:$0xff]  ;;  %780 = vst.msk [vmem:[#allocation2 + $0xa8] sm:$0xff] %vm305_vm1, %v747_v29  ;;  %v1669_v42 = vpop.f32.mrf.mxu0  ;;  %v1671_v43 = vpop.f32.mrf.mxu1  ;;  %v362_v29 = vld [vmem:[#allocation2 + $0xc0] sm:$0xff] }
  0xf3   : > { %v816_v41 = vld [vmem:[#allocation2 + $0xb0] sm:$0xff]  ;;  %1067 = vst.msk [vmem:[%s1653_s13 + $0x8] sm:$0xf] %vm1064_vm3, %v1306_v32  ;;  %v1304_v44 = vpack.c.bf16 %v904_v34, %v904_v34  ;;  %v839_v46 = vmul.f32 %v1627_v50, %v800_v40  ;;  %v907_v48 = vmax.f32 %v875_v36, 0.0  ;;  %v873_v51 = vadd.f32 %v1634_v58, %v834_v38  ;;  %v349_v32 = vld [vmem:[#allocation2 + $0x58] sm:$0xff]  ;;  %v347_v40 = vld [vmem:[#allocation2 + $0x48] sm:$0xff] }
  0xf4   : > { %1083 = vst.msk [vmem:[%s1653_s13 + $0x48] sm:$0xf] %vm1064_vm3, %v1322_v33  ;;  %v1320_v45 = vpack.c.bf16 %v920_v35, %v920_v35  ;;  %v855_v47 = vmul.f32 %v1627_v50, %v816_v41  ;;  %v923_v49 = vmax.f32 %v891_v37, 0.0  ;;  %v889_v52 = vadd.f32 %v1634_v58, %v850_v39  ;;  %v798_v53 = vld [vmem:[#allocation2 + $0x20] sm:$0xff]  ;;  %v1681_v55 = vpop.f32.mrf.mxu0  ;;  %v1683_v56 = vpop.f32.mrf.mxu1  ;;  %v365_v33 = vld [vmem:[#allocation2 + $0xd8] sm:$0xff] }
  0xf5   : > { %v814_v54 = vld [vmem:[#allocation2 + $0xa0] sm:$0xff]  ;;  %1065 = vst.msk [vmem:[%s1653_s13] sm:$0xf] %vm1064_vm3, %v1304_v44  ;;  %v878_v57 = vadd.f32 %v1634_v58, %v839_v46  ;;  %v837_v60 = vmul.f32 %v1627_v50, %v798_v53  ;;  %v1307_v62 = vpack.c.bf16 %v907_v48, %v907_v48  ;;  %v905_v0 = vmax.f32 %v873_v51, 0.0  ;;  %v352_v48 = vld [vmem:[#allocation2 + $0x70] sm:$0xff] }
  0xf6   : > { %1081 = vst.msk [vmem:[%s1653_s13 + $0x40] sm:$0xf] %vm1064_vm3, %v1320_v45  ;;  %v894_v59 = vadd.f32 %v1634_v58, %v855_v47  ;;  %v853_v61 = vmul.f32 %v1627_v50, %v814_v54  ;;  %v1323_v63 = vpack.c.bf16 %v923_v49, %v923_v49  ;;  %v921_v1 = vmax.f32 %v889_v52, 0.0  ;;  %v1693_v2 = vpop.f32.mrf.mxu0  ;;  %v1695_v3 = vpop.f32.mrf.mxu1  ;;  %v801_v8 = vld [vmem:[#allocation2 + $0x38] sm:$0xff]  ;;  %v363_v47 = vld [vmem:[#allocation2 + $0xc8] sm:$0xff]  ;;  %v368_v49 = vld [vmem:[#allocation2 + $0xf0] sm:$0xff] }
  0xf7   : > { %v910_v4 = vmax.f32 %v878_v57, 0.0  ;;  %v876_v6 = vadd.f32 %v1634_v58, %v837_v60  ;;  %v817_v9 = vld [vmem:[#allocation2 + $0xb8] sm:$0xff]  ;;  %1068 = vst.msk [vmem:[%s1653_s13 + $0xc] sm:$0xf] %vm1064_vm3, %v1307_v62  ;;  %v1305_v10 = vpack.c.bf16 %v905_v0, %v905_v0  ;;  %v840_v12 = vmul.f32 %v1627_v50, %v801_v8  ;;  %v350_v57 = vld [vmem:[#allocation2 + $0x60] sm:$0xff] }
  0xf8   : > { %v926_v5 = vmax.f32 %v894_v59, 0.0  ;;  %v892_v7 = vadd.f32 %v1634_v58, %v853_v61  ;;  %1084 = vst.msk [vmem:[%s1653_s13 + $0x4c] sm:$0xf] %vm1064_vm3, %v1323_v63  ;;  %v1321_v11 = vpack.c.bf16 %v921_v1, %v921_v1  ;;  %v856_v13 = vmul.f32 %v1627_v50, %v817_v9  ;;  %v1378_v16 = vpop.f32.mrf.mxu0  ;;  %v1394_v17 = vpop.f32.mrf.mxu1  ;;  %v799_v22 = vld [vmem:[#allocation2 + $0x28] sm:$0xff]  ;;  %v366_v59 = vld [vmem:[#allocation2 + $0xe0] sm:$0xff]  ;;  %v353_v60 = vld [vmem:[#allocation2 + $0x78] sm:$0xff] }
  0xf9   : > { %v1310_v18 = vpack.c.bf16 %v910_v4, %v910_v4  ;;  %v908_v20 = vmax.f32 %v876_v6, 0.0  ;;  %v815_v23 = vld [vmem:[#allocation2 + $0xa8] sm:$0xff]  ;;  %1066 = vst.msk [vmem:[%s1653_s13 + $0x4] sm:$0xf] %vm1064_vm3, %v1305_v10  ;;  %v879_v25 = vadd.f32 %v1634_v58, %v840_v12  ;;  %v838_v27 = vmul.f32 %v1627_v50, %v799_v22  ;;  %v369_v1 = vld [vmem:[#allocation2 + $0xf8] sm:$0xff] }
  0xfa   : > { %v1326_v19 = vpack.c.bf16 %v926_v5, %v926_v5  ;;  %v924_v21 = vmax.f32 %v892_v7, 0.0  ;;  %1082 = vst.msk [vmem:[%s1653_s13 + $0x44] sm:$0xf] %vm1064_vm3, %v1321_v11  ;;  %v895_v26 = vadd.f32 %v1634_v58, %v856_v13  ;;  %v854_v28 = vmul.f32 %v1627_v50, %v815_v23  ;;  %v647_v34 = vpop.f32.mrf.mxu0  ;;  %v711_v35 = vpop.f32.mrf.mxu1  ;;  %v351_v4 = vld [vmem:[#allocation2 + $0x68] sm:$0xff] }
  0xfb   : > { %1071 = vst.msk [vmem:[%s1653_s13 + $0x18] sm:$0xf] %vm1064_vm3, %v1310_v18  ;;  %v1308_v36 = vpack.c.bf16 %v908_v20, %v908_v20  ;;  %v736_v38 = vadd.f32 %v1659_v30, %v348_v14  ;;  %v752_v39 = vadd.f32 %v1661_v31, %v364_v15  ;;  %v911_v41 = vmax.f32 %v879_v25, 0.0  ;;  %v367_v6 = vld [vmem:[#allocation2 + $0xe8] sm:$0xff] }
  0xfc   : > { %1087 = vst.msk [vmem:[%s1653_s13 + $0x58] sm:$0xf] %vm1064_vm3, %v1326_v19  ;;  %v1324_v37 = vpack.c.bf16 %v924_v21, %v924_v21  ;;  %v927_v44 = vmax.f32 %v895_v26, 0.0  ;;  %v877_v45 = vadd.f32 %v1634_v58, %v838_v27  ;;  %v893_v46 = vadd.f32 %v1634_v58, %v854_v28  ;;  %v1379_v51 = vpop.f32.mrf.mxu0  ;;  %v1395_v52 = vpop.f32.mrf.mxu1 }
  0xfd   : > { %1069 = vst.msk [vmem:[%s1653_s13 + $0x10] sm:$0xf] %vm1064_vm3, %v1308_v36  ;;  %v734_v30 = vadd.f32 %v1669_v42, %v346_v24  ;;  %v750_v31 = vadd.f32 %v1671_v43, %v362_v29  ;;  %v737_v53 = vadd.f32 %v1681_v55, %v349_v32  ;;  %v753_v54 = vadd.f32 %v1683_v56, %v365_v33 }
  0xfe   : > { %1085 = vst.msk [vmem:[%s1653_s13 + $0x50] sm:$0xf] %vm1064_vm3, %v1324_v37  ;;  %v1311_v61 = vpack.c.bf16 %v911_v41, %v911_v41  ;;  %v1327_v62 = vpack.c.bf16 %v927_v44, %v927_v44  ;;  %v909_v63 = vmax.f32 %v877_v45, 0.0  ;;  %v925_v0 = vmax.f32 %v893_v46, 0.0  ;;  %v650_v5 = vpop.f32.mrf.mxu0  ;;  %v714_v42 = vpop.f32.mrf.mxu1 }
  0xff   : > { %769 = vst.msk [vmem:[#allocation2 + $0x50] sm:$0xff] %vm305_vm1, %v736_v38  ;;  %785 = vst.msk [vmem:[#allocation2 + $0xd0] sm:$0xff] %vm305_vm1, %v752_v39  ;;  %v735_v43 = vadd.f32 %v1693_v2, %v347_v40  ;;  %v751_v55 = vadd.f32 %v1695_v3, %v363_v47  ;;  %v740_v56 = vadd.f32 %v1378_v16, %v352_v48 }
 0x100   : > { %767 = vst.msk [vmem:[#allocation2 + $0x40] sm:$0xff] %vm305_vm1, %v734_v30  ;;  %783 = vst.msk [vmem:[#allocation2 + $0xc0] sm:$0xff] %vm305_vm1, %v750_v31  ;;  %v756_v7 = vadd.f32 %v1394_v17, %v368_v49  ;;  %v1309_v8 = vpack.c.bf16 %v909_v63, %v909_v63  ;;  %v1325_v9 = vpack.c.bf16 %v925_v0, %v925_v0 }
 0x101   : > { %770 = vst.msk [vmem:[#allocation2 + $0x58] sm:$0xff] %vm305_vm1, %v737_v53  ;;  %786 = vst.msk [vmem:[#allocation2 + $0xd8] sm:$0xff] %vm305_vm1, %v753_v54  ;;  %v738_v10 = vadd.f32 %v647_v34, %v350_v57  ;;  %v754_v11 = vadd.f32 %v711_v35, %v366_v59  ;;  %v741_v2 = vadd.f32 %v1379_v51, %v353_v60 }
 0x102   : > { %1072 = vst.msk [vmem:[%s1653_s13 + $0x1c] sm:$0xf] %vm1064_vm3, %v1311_v61  ;;  %1088 = vst.msk [vmem:[%s1653_s13 + $0x5c] sm:$0xf] %vm1064_vm3, %v1327_v62  ;;  %v757_v3 = vadd.f32 %v1395_v52, %v369_v1  ;;  %v739_v12 = vadd.f32 %v650_v5, %v351_v4  ;;  %v755_v13 = vadd.f32 %v714_v42, %v367_v6 }
 0x103   : > { %768 = vst.msk [vmem:[#allocation2 + $0x48] sm:$0xff] %vm305_vm1, %v735_v43  ;;  %784 = vst.msk [vmem:[#allocation2 + $0xc8] sm:$0xff] %vm305_vm1, %v751_v55 }
 0x104   : > { %773 = vst.msk [vmem:[#allocation2 + $0x70] sm:$0xff] %vm305_vm1, %v740_v56  ;;  %789 = vst.msk [vmem:[#allocation2 + $0xf0] sm:$0xff] %vm305_vm1, %v756_v7 }
 0x105   : > { %1070 = vst.msk [vmem:[%s1653_s13 + $0x14] sm:$0xf] %vm1064_vm3, %v1309_v8  ;;  %1086 = vst.msk [vmem:[%s1653_s13 + $0x54] sm:$0xf] %vm1064_vm3, %v1325_v9 }
 0x106   : > { %771 = vst.msk [vmem:[#allocation2 + $0x60] sm:$0xff] %vm305_vm1, %v738_v10  ;;  %787 = vst.msk [vmem:[#allocation2 + $0xe0] sm:$0xff] %vm305_vm1, %v754_v11  ;;  %v804_v14 = vld [vmem:[#allocation2 + $0x50] sm:$0xff] }
 0x107   : > { %774 = vst.msk [vmem:[#allocation2 + $0x78] sm:$0xff] %vm305_vm1, %v741_v2  ;;  %790 = vst.msk [vmem:[#allocation2 + $0xf8] sm:$0xff] %vm305_vm1, %v757_v3  ;;  %v820_v15 = vld [vmem:[#allocation2 + $0xd0] sm:$0xff]  ;;  %v843_v16 = vmul.f32 %v1627_v50, %v804_v14  ;;  %v802_v18 = vld [vmem:[#allocation2 + $0x40] sm:$0xff] }
 0x108   : > { %772 = vst.msk [vmem:[#allocation2 + $0x68] sm:$0xff] %vm305_vm1, %v739_v12  ;;  %788 = vst.msk [vmem:[#allocation2 + $0xe8] sm:$0xff] %vm305_vm1, %v755_v13  ;;  %v859_v17 = vmul.f32 %v1627_v50, %v820_v15  ;;  %v818_v19 = vld [vmem:[#allocation2 + $0xc0] sm:$0xff]  ;;  %v805_v20 = vld [vmem:[#allocation2 + $0x58] sm:$0xff]  ;;  %v841_v23 = vmul.f32 %v1627_v50, %v802_v18 }
 0x109   : > { %v882_v21 = vadd.f32 %v1634_v58, %v843_v16  ;;  %v857_v24 = vmul.f32 %v1627_v50, %v818_v19  ;;  %v821_v25 = vld [vmem:[#allocation2 + $0xd8] sm:$0xff]  ;;  %v844_v26 = vmul.f32 %v1627_v50, %v805_v20 }
 0x10a   : > { %v898_v22 = vadd.f32 %v1634_v58, %v859_v17  ;;  %v860_v27 = vmul.f32 %v1627_v50, %v821_v25  ;;  %v803_v28 = vld [vmem:[#allocation2 + $0x48] sm:$0xff]  ;;  %v880_v34 = vadd.f32 %v1634_v58, %v841_v23 }
 0x10b   : > { %v819_v29 = vld [vmem:[#allocation2 + $0xc8] sm:$0xff]  ;;  %v914_v32 = vmax.f32 %v882_v21, 0.0  ;;  %v896_v35 = vadd.f32 %v1634_v58, %v857_v24  ;;  %v883_v36 = vadd.f32 %v1634_v58, %v844_v26  ;;  %v842_v38 = vmul.f32 %v1627_v50, %v803_v28  ;;  %v808_v40 = vld [vmem:[#allocation2 + $0x70] sm:$0xff] }
 0x10c   : > { %v930_v33 = vmax.f32 %v898_v22, 0.0  ;;  %v899_v37 = vadd.f32 %v1634_v58, %v860_v27  ;;  %v858_v39 = vmul.f32 %v1627_v50, %v819_v29  ;;  %v824_v41 = vld [vmem:[#allocation2 + $0xf0] sm:$0xff]  ;;  %v912_v46 = vmax.f32 %v880_v34, 0.0 }
 0x10d   : > { %v1314_v44 = vpack.c.bf16 %v914_v32, %v914_v32  ;;  %v928_v47 = vmax.f32 %v896_v35, 0.0  ;;  %v915_v48 = vmax.f32 %v883_v36, 0.0  ;;  %v881_v51 = vadd.f32 %v1634_v58, %v842_v38  ;;  %v806_v30 = vld [vmem:[#allocation2 + $0x60] sm:$0xff] }
 0x10e   : > { %v1330_v45 = vpack.c.bf16 %v930_v33, %v930_v33  ;;  %v931_v49 = vmax.f32 %v899_v37, 0.0  ;;  %v897_v52 = vadd.f32 %v1634_v58, %v858_v39  ;;  %v822_v31 = vld [vmem:[#allocation2 + $0xe0] sm:$0xff]  ;;  %v1312_v53 = vpack.c.bf16 %v912_v46, %v912_v46  ;;  %v809_v60 = vld [vmem:[#allocation2 + $0x78] sm:$0xff] }
 0x10f   : > { %1075 = vst.msk [vmem:[%s1653_s13 + $0x28] sm:$0xf] %vm1064_vm3, %v1314_v44  ;;  %v1328_v54 = vpack.c.bf16 %v928_v47, %v928_v47  ;;  %v847_v57 = vmul.f32 %v1627_v50, %v808_v40  ;;  %v863_v59 = vmul.f32 %v1627_v50, %v824_v41  ;;  %v825_v61 = vld [vmem:[#allocation2 + $0xf8] sm:$0xff]  ;;  %v1315_v62 = vpack.c.bf16 %v915_v48, %v915_v48  ;;  %v807_v43 = vld [vmem:[#allocation2 + $0x68] sm:$0xff] }
 0x110   : > { %1091 = vst.msk [vmem:[%s1653_s13 + $0x68] sm:$0xf] %vm1064_vm3, %v1330_v45  ;;  %v1331_v63 = vpack.c.bf16 %v931_v49, %v931_v49  ;;  %v913_v0 = vmax.f32 %v881_v51, 0.0  ;;  %v929_v1 = vmax.f32 %v897_v52, 0.0  ;;  %1073 = vst.msk [vmem:[%s1653_s13 + $0x20] sm:$0xf] %vm1064_vm3, %v1312_v53  ;;  %v845_v6 = vmul.f32 %v1627_v50, %v806_v30 }
 0x111   : > { %1089 = vst.msk [vmem:[%s1653_s13 + $0x60] sm:$0xf] %vm1064_vm3, %v1328_v54  ;;  %v886_v4 = vadd.f32 %v1634_v58, %v847_v57  ;;  %v902_v5 = vadd.f32 %v1634_v58, %v863_v59  ;;  %v861_v42 = vmul.f32 %v1627_v50, %v822_v31  ;;  %v823_v55 = vld [vmem:[#allocation2 + $0xe8] sm:$0xff]  ;;  %1076 = vst.msk [vmem:[%s1653_s13 + $0x2c] sm:$0xf] %vm1064_vm3, %v1315_v62 }
 0x112   : > { %1092 = vst.msk [vmem:[%s1653_s13 + $0x6c] sm:$0xf] %vm1064_vm3, %v1331_v63  ;;  %v1313_v56 = vpack.c.bf16 %v913_v0, %v913_v0  ;;  %v1329_v7 = vpack.c.bf16 %v929_v1, %v929_v1  ;;  %v848_v8 = vmul.f32 %v1627_v50, %v809_v60  ;;  %v864_v9 = vmul.f32 %v1627_v50, %v825_v61 }
 0x113   : > { %v918_v10 = vmax.f32 %v886_v4, 0.0  ;;  %v934_v11 = vmax.f32 %v902_v5, 0.0  ;;  %v884_v2 = vadd.f32 %v1634_v58, %v845_v6  ;;  %v900_v3 = vadd.f32 %v1634_v58, %v861_v42 }
 0x114   : > { %1074 = vst.msk [vmem:[%s1653_s13 + $0x24] sm:$0xf] %vm1064_vm3, %v1313_v56  ;;  %1090 = vst.msk [vmem:[%s1653_s13 + $0x64] sm:$0xf] %vm1064_vm3, %v1329_v7  ;;  %v887_v12 = vadd.f32 %v1634_v58, %v848_v8  ;;  %v903_v13 = vadd.f32 %v1634_v58, %v864_v9  ;;  %v846_v14 = vmul.f32 %v1627_v50, %v807_v43 }
 0x115   : > { %v862_v15 = vmul.f32 %v1627_v50, %v823_v55  ;;  %v1318_v16 = vpack.c.bf16 %v918_v10, %v918_v10  ;;  %v1334_v17 = vpack.c.bf16 %v934_v11, %v934_v11  ;;  %v916_v18 = vmax.f32 %v884_v2, 0.0 }
 0x116   : > { %v932_v19 = vmax.f32 %v900_v3, 0.0  ;;  %v919_v20 = vmax.f32 %v887_v12, 0.0  ;;  %v935_v21 = vmax.f32 %v903_v13, 0.0  ;;  %v885_v22 = vadd.f32 %v1634_v58, %v846_v14 }
 0x117   : > { %v901_v23 = vadd.f32 %v1634_v58, %v862_v15  ;;  %1079 = vst.msk [vmem:[%s1653_s13 + $0x38] sm:$0xf] %vm1064_vm3, %v1318_v16  ;;  %1095 = vst.msk [vmem:[%s1653_s13 + $0x78] sm:$0xf] %vm1064_vm3, %v1334_v17  ;;  %v1316_v50 = vpack.c.bf16 %v916_v18, %v916_v18 }
 0x118   : > { %v1332_v24 = vpack.c.bf16 %v932_v19, %v932_v19  ;;  %v1319_v25 = vpack.c.bf16 %v919_v20, %v919_v20  ;;  %v1335_v26 = vpack.c.bf16 %v935_v21, %v935_v21  ;;  %v917_v27 = vmax.f32 %v885_v22, 0.0 }
 0x119   : > { %v933_v28 = vmax.f32 %v901_v23, 0.0  ;;  %1077 = vst.msk [vmem:[%s1653_s13 + $0x30] sm:$0xf] %vm1064_vm3, %v1316_v50 }
 0x11a   : > { %1093 = vst.msk [vmem:[%s1653_s13 + $0x70] sm:$0xf] %vm1064_vm3, %v1332_v24  ;;  %1080 = vst.msk [vmem:[%s1653_s13 + $0x3c] sm:$0xf] %vm1064_vm3, %v1319_v25  ;;  %v1317_v58 = vpack.c.bf16 %v917_v27, %v917_v27 }
 0x11b   : > { %1096 = vst.msk [vmem:[%s1653_s13 + $0x7c] sm:$0xf] %vm1064_vm3, %v1335_v26  ;;  %v1333_v29 = vpack.c.bf16 %v933_v28, %v933_v28 }
 0x11c   : > { %1078 = vst.msk [vmem:[%s1653_s13 + $0x34] sm:$0xf] %vm1064_vm3, %v1317_v58 }
 0x11d   : > { %1094 = vst.msk [vmem:[%s1653_s13 + $0x74] sm:$0xf] %vm1064_vm3, %v1333_v29 }
 0x11e PF: > { %s14_s17 = sadd.s32 1, %s1472_s17   ;;  %s1834_s15 = smov %s1468_s16 }
 0x11f   : > { %p11_p5 = scmp.ge.s32.totalorder %s14_s17, 10   ;;  %s1835_s16 = smov %s1837_s18 }
 0x121   :  { %13 = sbr.rel (!%p11_p5) target bundleno = 2 (0x2), region = 83 }

</bundles_post_ra>
